<compile_context>
chip_gen: v6e
topology: v6e:2x2x1
jax: 0.10.0
libtpu: 0.0.40
codegen_flags: <defaults>
</compile_context>

<pallas_src>
import functools

import jax
import jax.numpy as jnp
from jax import lax
from jax.experimental import pallas as pl
from jax.experimental.pallas import tpu as pltpu

_EPS = 1e-12        # matches torch F.normalize default eps
_NEG_BIG = -1e30    # "-inf" stand-in that stays NaN-free through exp()


def _round_up(x, m):
    return ((x + m - 1) // m) * m


def _pad2d(x, rows, cols):
    r, c = x.shape
    if r == rows and c == cols:
        return x
    return jnp.pad(x, ((0, rows - r), (0, cols - c)))


def _l2_normalize(x):
    # rsqrt(max(sum(x^2), eps^2)) ~= 1/max(||x||, eps) (torch semantics up to a
    # microscopic band around eps).
    x = x.astype(jnp.float32)
    return x * lax.rsqrt(
        jnp.maximum(jnp.sum(x * x, axis=-1, keepdims=True),
                    jnp.float32(_EPS * _EPS)))


def _infonce_kernel(q_ref, k_ref, pos_ref, out_ref, m_scr, l_scr, *,
                    num_valid_keys, block_k, pos_in_keys, mask_needed):
    """One (query-row tile, key tile) step of the online-logsumexp InfoNCE loss.

    q_ref:   (bq, dpad) pre-normalized query rows, already scaled by 1/T (MXU dtype)
    k_ref:   (bk, dpad) pre-normalized key rows (MXU dtype)
    pos_ref: (bq, 1)    positive logit per query row, already scaled by 1/T (f32)
    """
    j = pl.program_id(1)
    nj = pl.num_programs(1)

    # ---- per-row-tile init of the running softmax state ----
    @pl.when(j == 0)
    def _init():
        if pos_in_keys:
            # self-supervised path: the diagonal appears during the key sweep.
            m_scr[...] = jnp.full_like(m_scr, _NEG_BIG)
            l_scr[...] = jnp.zeros_like(l_scr)
        else:
            # unpaired negatives: seed the running softmax with the positive logit.
            m_scr[...] = pos_ref[...]
            l_scr[...] = jnp.ones_like(l_scr)

    # ---- similarity tile on the MXU (contract the feature axis; standard
    #      flash-attention q·kᵀ orientation, no key transpose materialized) ----
    logits = lax.dot_general(q_ref[...], k_ref[...],
                             (((1,), (1,)), ((), ())),
                             preferred_element_type=jnp.float32)     # (bq, bk)

    def _update(lg):
        m_prev = m_scr[...]
        m_new = jnp.maximum(m_prev, jnp.max(lg, axis=-1, keepdims=True))
        alpha = jnp.exp(m_prev - m_new)
        l_scr[...] = alpha * l_scr[...] + jnp.sum(jnp.exp(lg - m_new),
                                                  axis=-1, keepdims=True)
        m_scr[...] = m_new

    if mask_needed:
        # Padding columns only exist in the last key tile: run the plain update
        # on all other tiles (zero masking cost there).
        @pl.when(j < nj - 1)
        def _plain():
            _update(logits)

        @pl.when(j == nj - 1)
        def _masked():
            col = j * block_k + lax.broadcasted_iota(jnp.int32, (1, block_k), 1)
            _update(jnp.where(col < num_valid_keys, logits,
                              jnp.float32(_NEG_BIG)))
    else:
        _update(logits)

    # ---- finalize: per-row cross-entropy ----
    @pl.when(j == nj - 1)
    def _finalize():
        lse = m_scr[...] + jnp.log(l_scr[...])
        out_ref[...] = (lse - pos_ref[...]).astype(out_ref.dtype)


def info_nce_pallas(query, positive_key, negative_keys=None, temperature=1.0,
                    reduction='mean', negative_mode='unpaired',
                    block_q=256, block_k=512, use_bf16_matmul=None,
                    vmem_budget_bytes=40 * 1024 * 1024):
    """Mirrors InfoNCE.forward. Per-row losses computed in-kernel, reduced here."""
    if query.ndim != 2 or positive_key.ndim != 2:
        raise ValueError('<query>/<positive_key> must have 2 dimensions.')
    if query.shape != positive_key.shape:
        raise ValueError('<query> and <positive_key> must have matching shapes.')
    if negative_keys is not None:
        if negative_mode == 'paired':
            # TODO(synk): negative_mode='paired' (3-D per-sample negatives) not wired up.
            raise NotImplementedError("negative_mode='paired' is not implemented")
        if negative_keys.ndim != 2 or negative_keys.shape[-1] != query.shape[-1]:
            raise ValueError('<negative_keys> must be [M, D] with matching D.')

    n, d = query.shape
    if negative_keys is None:
        raw_keys, num_valid_keys, pos_in_keys = positive_key, n, True
    else:
        raw_keys, num_valid_keys, pos_in_keys = (
            negative_keys, negative_keys.shape[0], False)
    nkeys = raw_keys.shape[0]

    # MXU dtype: bf16 if the inputs are bf16 or explicitly requested, else f32
    # (keeps numerics tight for f32 callers; bf16 matmul is the fast path on v5e).
    if use_bf16_matmul is None:
        use_bf16_matmul = (query.dtype == jnp.bfloat16)
    mxu_dtype = jnp.bfloat16 if use_bf16_matmul else jnp.float32
    itemsize = 2 if use_bf16_matmul else 4
    sub = 16 if itemsize == 2 else 8      # packed-dtype sublane multiple

    inv_t = jnp.float32(1.0 / float(temperature))

    # ---- wrapper-side (one-shot, fused XLA) normalization + positive logit ----
    qn = _l2_normalize(query)                               # (n, d) f32
    pn = _l2_normalize(positive_key)                        # (n, d) f32
    pos = jnp.sum(qn * pn, axis=-1, keepdims=True) * inv_t  # (n, 1) f32, /T folded
    q_feed = (qn * inv_t).astype(mxu_dtype)                 # 1/T folded into rows
    kn = pn.astype(mxu_dtype) if pos_in_keys else _l2_normalize(raw_keys).astype(mxu_dtype)

    # MXU-friendly tiles, shrunk for tiny inputs and to fit the VMEM budget.
    dpad = _round_up(d, 128)
    bq = min(_round_up(block_q, sub), _round_up(n, sub))
    bk = min(_round_up(block_k, sub), _round_up(nkeys, sub))

    def vmem_est(bq_, bk_):
        # double-buffered q/key/pos inputs + output + m/l scratch
        return (2 * bq_ * dpad * itemsize + 2 * bk_ * dpad * itemsize
                + 2 * bq_ * 4 * 3 + 2 * bq_ * 4)

    while bk > sub and vmem_est(bq, bk) > vmem_budget_bytes:
        bk = max(sub, _round_up(bk // 2, sub))
    while bq > sub and vmem_est(bq, bk) > vmem_budget_bytes:
        bq = max(sub, _round_up(bq // 2, sub))

    npad = _round_up(n, bq)
    kpad = _round_up(nkeys, bk)
    mask_needed = (kpad != num_valid_keys)

    q_p = _pad2d(q_feed, npad, dpad)
    k_p = _pad2d(kn, kpad, dpad)
    pos_p = _pad2d(pos, npad, 1)

    grid = (npad // bq, kpad // bk)
    kernel = functools.partial(_infonce_kernel,
                               num_valid_keys=int(num_valid_keys),
                               block_k=int(bk),
                               pos_in_keys=pos_in_keys,
                               mask_needed=mask_needed)

    cost = pl.CostEstimate(
        flops=int(2 * npad * kpad * dpad),
        transcendentals=int(npad * kpad),
        bytes_accessed=int((npad // bq) * kpad * dpad * itemsize
                           + npad * dpad * itemsize + 2 * npad * 4))

    per_row = pl.pallas_call(
        kernel,
        out_shape=jax.ShapeDtypeStruct((npad, 1), jnp.float32),
        grid_spec=pltpu.PrefetchScalarGridSpec(
            num_scalar_prefetch=0,
            grid=grid,
            in_specs=[
                pl.BlockSpec((bq, dpad), lambda i, j: (i, 0)),   # normalized q rows
                pl.BlockSpec((bk, dpad), lambda i, j: (j, 0)),   # normalized key tile
                pl.BlockSpec((bq, 1), lambda i, j: (i, 0)),      # positive logit
            ],
            out_specs=pl.BlockSpec((bq, 1), lambda i, j: (i, 0)),
            scratch_shapes=[
                pltpu.VMEM((bq, 1), jnp.float32),   # running max
                pltpu.VMEM((bq, 1), jnp.float32),   # running sum-exp
            ]),
        compiler_params=pltpu.CompilerParams(
            dimension_semantics=("parallel", "arbitrary"),
            vmem_limit_bytes=int(min(128 * 1024 * 1024,
                                     max(32 * 1024 * 1024,
                                         vmem_est(bq, bk) + 16 * 1024 * 1024)))),
        cost_estimate=cost,
    )(q_p, k_p, pos_p)

    losses = per_row[:n, 0]
    if reduction == 'mean':
        return jnp.mean(losses)
    if reduction == 'sum':
        return jnp.sum(losses)
    return losses        # reduction == 'none'


# ---------------------------- pure-JAX reference ----------------------------
def _info_nce_ref(query, positive_key, negative_keys=None, temperature=1.0,
                  reduction='mean'):
    def norm(x):
        nrm = jnp.sqrt(jnp.sum(x * x, axis=-1, keepdims=True))
        return x / jnp.maximum(nrm, _EPS)
    qn = norm(query.astype(jnp.float32))
    pn = norm(positive_key.astype(jnp.float32))
    if negative_keys is None:
        logits = qn @ pn.T
        labels = jnp.arange(logits.shape[0])
    else:
        nkn = norm(negative_keys.astype(jnp.float32))
        pos = jnp.sum(qn * pn, axis=-1, keepdims=True)
        logits = jnp.concatenate([pos, qn @ nkn.T], axis=1)
        labels = jnp.zeros(logits.shape[0], dtype=jnp.int32)
    logits = logits / temperature
    lse = jax.scipy.special.logsumexp(logits, axis=-1)
    true = jnp.take_along_axis(logits, labels[:, None], axis=1)[:, 0]
    per_row = lse - true
    if reduction == 'mean':
        return jnp.mean(per_row)
    if reduction == 'sum':
        return jnp.sum(per_row)
    return per_row


if __name__ == "__main__":
    key = jax.random.PRNGKey(0)
    k1, k2, k3 = jax.random.split(key, 3)
    N, D, M = 16, 32, 20
    query = jax.random.normal(k1, (N, D), dtype=jnp.float32)
    positive_key = jax.random.normal(k2, (N, D), dtype=jnp.float32)
    negative_keys = jax.random.normal(k3, (M, D), dtype=jnp.float32)

    # 1) default forward: negative_keys=None, temperature=1.0 (single tile, no mask)
    out = jax.block_until_ready(info_nce_pallas(query, positive_key))
    ref = _info_nce_ref(query, positive_key)
    assert jnp.allclose(out, ref, rtol=2e-5, atol=2e-5), (out, ref)

    # 2) unpaired negatives, temperature != 1 (padded key tile -> masked branch)
    out = jax.block_until_ready(
        info_nce_pallas(query, positive_key, negative_keys, temperature=0.5))
    ref = _info_nce_ref(query, positive_key, negative_keys, temperature=0.5)
    assert jnp.allclose(out, ref, rtol=2e-5, atol=2e-5), (out, ref)

    # 3) force multiple row/key tiles to exercise online logsumexp (no padding)
    out = jax.block_until_ready(
        info_nce_pallas(query, positive_key, block_q=8, block_k=8))
    ref = _info_nce_ref(query, positive_key)
    assert jnp.allclose(out, ref, rtol=2e-5, atol=2e-5), (out, ref)

    # 4) multiple tiles + padded last key tile (masked vs. unmasked update paths)
    out = jax.block_until_ready(
        info_nce_pallas(query, positive_key, negative_keys, temperature=0.25,
                        block_q=8, block_k=8))
    ref = _info_nce_ref(query, positive_key, negative_keys, temperature=0.25)
    assert jnp.allclose(out, ref, rtol=2e-5, atol=2e-5), (out, ref)

    # 5) reduction='none' (per-sample losses)
    out = jax.block_until_ready(
        info_nce_pallas(query, positive_key, negative_keys, reduction='none'))
    ref = _info_nce_ref(query, positive_key, negative_keys, reduction='none')
    assert jnp.allclose(out, ref, rtol=2e-5, atol=2e-5)

    # 6) bf16 MXU fast path (f32 normalization, bf16 logits) -- looser tolerance
    out = jax.block_until_ready(
        info_nce_pallas(query, positive_key, negative_keys, temperature=0.5,
                        use_bf16_matmul=True))
    ref = _info_nce_ref(query, positive_key, negative_keys, temperature=0.5)
    assert jnp.allclose(out, ref, rtol=5e-2, atol=5e-2), (out, ref)

    print("KERNEL_OK")
</pallas_src>

<mosaic_0001>
module attributes {stable_mosaic.version = 11 : i64} {
  func.func @_infonce_kernel(%arg0: i32, %arg1: i32, %arg2: memref<16x128xf32, #tpu.memory_space<vmem>>, %arg3: memref<16x128xf32, #tpu.memory_space<vmem>>, %arg4: memref<16x1xf32, #tpu.memory_space<vmem>>, %arg5: memref<16x1xf32, #tpu.memory_space<vmem>>, %arg6: memref<16x1xf32, #tpu.memory_space<vmem>>, %arg7: memref<16x1xf32, #tpu.memory_space<vmem>>) attributes {dimension_semantics = [#tpu.dimension_semantics<parallel>, #tpu.dimension_semantics<arbitrary>], iteration_bounds = array<i64: 1, 1>, scalar_prefetch = 0 : i64, scratch_operands = 2 : i64, tpu.core_type = #tpu.core_type<tc>, window_params = [{transform_indices = @transform_0, window_bounds = array<i64: 16, 128>}, {transform_indices = @transform_1, window_bounds = array<i64: 16, 128>}, {transform_indices = @transform_2, window_bounds = array<i64: 16, 1>}, {transform_indices = @transform_3, window_bounds = array<i64: 16, 1>}]} {
    %c0_i32 = arith.constant 0 : i32
    %0 = arith.cmpi eq, %arg1, %c0_i32 : i32
    %1 = arith.extui %0 : i1 to i32
    %c0_i32_0 = arith.constant 0 : i32
    %2 = arith.cmpi ne, %1, %c0_i32_0 : i32
    scf.if %2 {
      %cst_16 = arith.constant -1.000000e+30 : f32
      %25 = vector.broadcast %cst_16 : f32 to vector<16x1xf32>
      %c0_17 = arith.constant 0 : index
      %c0_18 = arith.constant 0 : index
      %26 = vector.load %arg6[%c0_17, %c0_18] : memref<16x1xf32, #tpu.memory_space<vmem>>, vector<16x1xf32>
      tpu.vector_store %arg6[%c0_17, %c0_18], %25 {strides = array<i32>} : memref<16x1xf32, #tpu.memory_space<vmem>>, vector<16x1xf32>,
      %cst_19 = arith.constant 0.000000e+00 : f32
      %27 = vector.broadcast %cst_19 : f32 to vector<16x1xf32>
      %c0_20 = arith.constant 0 : index
      %c0_21 = arith.constant 0 : index
      %28 = vector.load %arg7[%c0_20, %c0_21] : memref<16x1xf32, #tpu.memory_space<vmem>>, vector<16x1xf32>
      tpu.vector_store %arg7[%c0_20, %c0_21], %27 {strides = array<i32>} : memref<16x1xf32, #tpu.memory_space<vmem>>, vector<16x1xf32>,
    } else {
    }
    %c0 = arith.constant 0 : index
    %c0_1 = arith.constant 0 : index
    %3 = vector.load %arg2[%c0, %c0_1] : memref<16x128xf32, #tpu.memory_space<vmem>>, vector<16x128xf32>
    %c0_2 = arith.constant 0 : index
    %c0_3 = arith.constant 0 : index
    %4 = vector.load %arg3[%c0_2, %c0_3] : memref<16x128xf32, #tpu.memory_space<vmem>>, vector<16x128xf32>
    %cst = arith.constant dense<0.000000e+00> : vector<16x16xf32>
    %5 = tpu.matmul %3, %4, %cst {dimension_numbers = #tpu.dot_dimension_numbers<[1], [1], [0], [0], [0, 0, 1, 0], [], []>} : vector<16x128xf32>, vector<16x128xf32>, vector<16x16xf32> -> vector<16x16xf32>
    %c0_4 = arith.constant 0 : index
    %c0_5 = arith.constant 0 : index
    %6 = vector.load %arg6[%c0_4, %c0_5] : memref<16x1xf32, #tpu.memory_space<vmem>>, vector<16x1xf32>
    %cst_6 = arith.constant dense<0xFF800000> : vector<16xf32>
    %7 = vector.multi_reduction <maximumf>, %5, %cst_6 [1] : vector<16x16xf32> to vector<16xf32>
    %8 = vector.shape_cast %7 : vector<16xf32> to vector<16x1xf32>
    %9 = arith.maximumf %6, %8 : vector<16x1xf32>
    %10 = arith.subf %6, %9 : vector<16x1xf32>
    %11 = math.exp %10 : vector<16x1xf32>
    %c0_7 = arith.constant 0 : index
    %c0_8 = arith.constant 0 : index
    %12 = vector.load %arg7[%c0_7, %c0_8] : memref<16x1xf32, #tpu.memory_space<vmem>>, vector<16x1xf32>
    %13 = arith.mulf %11, %12 : vector<16x1xf32>
    %14 = vector.broadcast %9 : vector<16x1xf32> to vector<16x16xf32>
    %15 = arith.subf %5, %14 : vector<16x16xf32>
    %16 = math.exp %15 : vector<16x16xf32>
    %cst_9 = arith.constant dense<0.000000e+00> : vector<16xf32>
    %17 = vector.multi_reduction <add>, %16, %cst_9 [1] : vector<16x16xf32> to vector<16xf32>
    %18 = vector.shape_cast %17 : vector<16xf32> to vector<16x1xf32>
    %19 = arith.addf %13, %18 : vector<16x1xf32>
    %c0_10 = arith.constant 0 : index
    %c0_11 = arith.constant 0 : index
    %20 = vector.load %arg7[%c0_10, %c0_11] : memref<16x1xf32, #tpu.memory_space<vmem>>, vector<16x1xf32>
    tpu.vector_store %arg7[%c0_10, %c0_11], %19 {strides = array<i32>} : memref<16x1xf32, #tpu.memory_space<vmem>>, vector<16x1xf32>,
    %c0_12 = arith.constant 0 : index
    %c0_13 = arith.constant 0 : index
    %21 = vector.load %arg6[%c0_12, %c0_13] : memref<16x1xf32, #tpu.memory_space<vmem>>, vector<16x1xf32>
    tpu.vector_store %arg6[%c0_12, %c0_13], %9 {strides = array<i32>} : memref<16x1xf32, #tpu.memory_space<vmem>>, vector<16x1xf32>,
    %c0_i32_14 = arith.constant 0 : i32
    %22 = arith.cmpi eq, %arg1, %c0_i32_14 : i32
    %23 = arith.extui %22 : i1 to i32
    %c0_i32_15 = arith.constant 0 : i32
    %24 = arith.cmpi ne, %23, %c0_i32_15 : i32
    scf.if %24 {
      %c0_16 = arith.constant 0 : index
      %c0_17 = arith.constant 0 : index
      %25 = vector.load %arg6[%c0_16, %c0_17] : memref<16x1xf32, #tpu.memory_space<vmem>>, vector<16x1xf32>
      %c0_18 = arith.constant 0 : index
      %c0_19 = arith.constant 0 : index
      %26 = vector.load %arg7[%c0_18, %c0_19] : memref<16x1xf32, #tpu.memory_space<vmem>>, vector<16x1xf32>
      %27 = math.log %26 : vector<16x1xf32>
      %28 = arith.addf %25, %27 : vector<16x1xf32>
      %c0_20 = arith.constant 0 : index
      %c0_21 = arith.constant 0 : index
      %29 = vector.load %arg4[%c0_20, %c0_21] : memref<16x1xf32, #tpu.memory_space<vmem>>, vector<16x1xf32>
      %30 = arith.subf %28, %29 : vector<16x1xf32>
      %c0_22 = arith.constant 0 : index
      %c0_23 = arith.constant 0 : index
      %31 = vector.load %arg5[%c0_22, %c0_23] : memref<16x1xf32, #tpu.memory_space<vmem>>, vector<16x1xf32>
      tpu.vector_store %arg5[%c0_22, %c0_23], %30 {strides = array<i32>} : memref<16x1xf32, #tpu.memory_space<vmem>>, vector<16x1xf32>,
    } else {
    }
    return
  }
  func.func @transform_0(%arg0: i32, %arg1: i32) -> (i32, i32) {
    %c0_i32 = arith.constant 0 : i32
    %c0_i32_0 = arith.constant 0 : i32
    return %arg0, %c0_i32 : i32, i32
  }
  func.func @transform_1(%arg0: i32, %arg1: i32) -> (i32, i32) {
    %c0_i32 = arith.constant 0 : i32
    %c0_i32_0 = arith.constant 0 : i32
    return %arg1, %c0_i32 : i32, i32
  }
  func.func @transform_2(%arg0: i32, %arg1: i32) -> (i32, i32) {
    %c0_i32 = arith.constant 0 : i32
    %c0_i32_0 = arith.constant 0 : i32
    return %arg0, %c0_i32 : i32, i32
  }
  func.func @transform_3(%arg0: i32, %arg1: i32) -> (i32, i32) {
    %c0_i32 = arith.constant 0 : i32
    %c0_i32_0 = arith.constant 0 : i32
    return %arg0, %c0_i32 : i32, i32
  }
}

</mosaic_0001>

<bundles_post_ra>
// kernel: tpu_custom_call.1
= control target key start
LH: loop header
LB: loop body
LE: loop exit
PB: predicated region body
PF: predicated region fallthrough
CT: control target
= control target key end

     0   :  { %8 = vsyncpa [#allocation5], 0  ;;  %s243_s12 = smov [#allocation4]   ;;  %s304_s0 = inlined_call_operand.vmem [shape: f32[16,128], index: 0, kind: input, shape index: {}]   ;;  %s305_s1 = inlined_call_operand.hbm [shape: f32[16,128], index: 1, kind: input, shape index: {}]   ;;  %s306_s2 = inlined_call_operand.vmem [shape: f32[16,1], index: 2, kind: input, shape index: {}]   ;;  %s307_s3 = inlined_call_operand.vmem [shape: f32[16,1], index: 3, kind: output, shape index: {}]  }
   0x1   :  { %s16_s13 = sshll.u32 %s243_s12, 4  ;;  %s17_s13 = int_to_ptr.vmem [resolvable:$true] %s16_s13 }
   0x2   :  { %s229_s14 = scalar_lea.vmem %s17_s13, 256  ;;  %p234_p1 = scmp.lt.s32.totalorder %s17_s13, %s17_s13 }
   0x3   :  { %p230_p0 = scmp.ne.s32.totalorder %s17_s13, %s229_s14  ;;  %p235_p2 = scmp.lt.s32.totalorder %s229_s14, %s229_s14 }
   0x5   :  { %p236_p3 = por %p235_p2, %p234_p1 }
   0x7   :  { %p237_p4 = pnand %p236_p3, %p230_p0 }
   0x9   :  { %240 = shalt.err (!%p237_p4)
}
   0xa   :  { %s244_s15 = smov 128   ;;  %s245_s16 = smov 8  }
   0xb   :  { %22 = dma.hbm_to_vmem [thread:$0]  %s305_s1, 256, %s17_s13, [#allocation5], %s244_s15, %s244_s15, %s245_s16  }
   0xc   :  { %241 = dma.done.wait [#allocation5], 256  }
   0xd   :  { %242 = vsyncadd [#allocation5], 4294967040  ;;  %v40_v0 = vld [vmem:[#allocation4 + $0x8] sm:$0xff]  ;;  %v39_v1 = vld [vmem:[#allocation4] sm:$0xff]  ;;  %vm32_vm0 = vcmask 7168   ;;  %vm118_vm1 = vcmask 130048  }
   0xe   :  { %v37_v2 = vld [vmem:[%s304_s0] sm:$0xff]  ;;  %194 = vmatprep.subr.mxu0 %v40_v0  ;;  %v38_v3 = vld [vmem:[%s304_s0 + $0x8] sm:$0xff]  ;;  %v246_v4 = vmov -1e+30   ;;  %v247_v9 = vmov 0   ;;  %v248_v10 = vmov 0.0  }
   0xf   :  { %198 = vmatprep.mubr.f32.mxu0 %v37_v2  ;;  %195 = vmatpush3.xpose.msra.mxu0 %v40_v0  ;;  %33 = vst.msk [vmem:[#allocation2] sm:$0xff] %vm32_vm0, %v246_v4  ;;  %34 = vst.msk [vmem:[#allocation2 + $0x8] sm:$0xff] %vm32_vm0, %v246_v4  ;;  %v179_v46 = vld [vmem:[%s306_s2] sm:$0xff]  ;;  %v180_v52 = vld [vmem:[%s306_s2 + $0x8] sm:$0xff] }
  0x10   :  { %196 = vmatprep.subr.mxu0 %v39_v1  ;;  %207 = vset.pattern.permute.xlu1 %v247_v9  ;;  %35 = vst.msk [vmem:[#allocation3] sm:$0xff] %vm32_vm0, %v248_v10  ;;  %36 = vst.msk [vmem:[#allocation3 + $0x8] sm:$0xff] %vm32_vm0, %v248_v10 }
  0x11   :  { %208 = vset.pattern.permute.xlu0 %v247_v9 }
  0x13   :  { %197 = vmatpush3.xpose.msra.mxu0 %v39_v1 }
  0x16   :  { %199 = vmatmul.mubr.f32.vlgmr.msra.gmra.mxu0 %v38_v3  ;;  %v116_v11 = vld [vmem:[#allocation2] sm:$0xff]  ;;  %v117_v14 = vld [vmem:[#allocation2 + $0x8] sm:$0xff] }
  0x17   :  { %v133_v32 = vld [vmem:[#allocation3] sm:$0xff]  ;;  %v134_v36 = vld [vmem:[#allocation3 + $0x8] sm:$0xff] }
  0xd6   :  { %v200_v5 = vpop.f32.mrf.mxu0 }
  0xd7   :  { %v122_v8 = vsel %vm118_vm1, %v200_v5, -inf }
  0xd8   :  { %v107_v6 = vpop.f32.mrf.mxu0 }
  0xd9   :  { %v119_v7 = vsel %vm118_vm1, %v107_v6, -inf }
  0xda   :  { %120 = vmax.xlane.f32.xlu0 %v119_v7 }
  0xde   :  { %123 = vmax.xlane.f32.xlu0 %v122_v8 }
 0x163   :  { %v121_v12 = vpop.xlane.xlu0 %120 }
 0x164   :  { %v125_v13 = vmax.f32 %v116_v11, %v121_v12 }
 0x166   :  { %v127_v15 = vsub.f32 %v116_v11, %v125_v13  ;;  %164 = vst.msk [vmem:[#allocation2] sm:$0xff] %vm32_vm0, %v125_v13  ;;  %139 = vperm.xlu1 %207, %v125_v13  }
 0x167   :  { %v124_v16 = vpop.xlane.xlu0 %123 }
 0x168   :  { %v126_v17 = vmax.f32 %v117_v14, %v124_v16  ;;  %v129_v29 = vmul.f32 1.442695, %v127_v15 }
 0x16a   :  { %v128_v18 = vsub.f32 %v117_v14, %v126_v17  ;;  %165 = vst.msk [vmem:[#allocation2 + $0x8] sm:$0xff] %vm32_vm0, %v126_v17  ;;  %144 = vperm.xlu1 %207, %v126_v17  }
 0x16c   :  { %v131_v30 = vmul.f32 1.442695, %v128_v18 }
 0x16d   :  { %v169_v45 = vld [vmem:[#allocation2] sm:$0xff] }
 0x171   :  { %v170_v51 = vld [vmem:[#allocation2 + $0x8] sm:$0xff] }
 0x1e1   :  { %v140_v19 = vpop.permute.xlu1 %139 }
 0x1e2   :  { %v147_v20 = vsub.f32 %v107_v6, %v140_v19 }
 0x1e4   :  { %v149_v21 = vmul.f32 1.442695, %v147_v20 }
 0x1e5   :  { %v145_v22 = vpop.permute.xlu1 %144 }
 0x1e6   :  { %209 = vpow2.f32 %v149_v21  ;;  %v148_v23 = vsub.f32 %v200_v5, %v145_v22 }
 0x1e8   :  { %v151_v24 = vmul.f32 1.442695, %v148_v23 }
 0x1ea   :  { %211 = vpow2.f32 %v151_v24 }
 0x1eb   :  { %213 = vpow2.f32 %v129_v29 }
 0x1ec   :  { %215 = vpow2.f32 %v131_v30 }
 0x1f3   :  { %v210_v25 = vpop.eup %209 }
 0x1f4   :  { %v153_v26 = vsel %vm118_vm1, %v210_v25, 0.0 }
 0x1f5   :  { %154 = vadd.xlane.f32.xlu0 %v153_v26 }
 0x1f7   :  { %v212_v27 = vpop.eup %211 }
 0x1f8   :  { %v156_v28 = vsel %vm118_vm1, %v212_v27, 0.0  ;;  %v214_v31 = vpop.eup %213 }
 0x1f9   :  { %157 = vadd.xlane.f32.xlu1 %v156_v28  ;;  %v135_v33 = vmul.f32 %v214_v31, %v133_v32  ;;  %v216_v34 = vpop.eup %215 }
 0x1fa   :  { %v136_v38 = vmul.f32 %v216_v34, %v134_v36 }
 0x27e   :  { %v155_v35 = vpop.xlane.xlu0 %154 }
 0x27f   :  { %v159_v37 = vadd.f32 %v155_v35, %v135_v33 }
 0x281   :  { %162 = vst.msk [vmem:[#allocation3] sm:$0xff] %vm32_vm0, %v159_v37 }
 0x282   :  { %v158_v39 = vpop.xlane.xlu1 %157 }
 0x283   :  { %v160_v40 = vadd.f32 %v158_v39, %v136_v38 }
 0x285   :  { %163 = vst.msk [vmem:[#allocation3 + $0x8] sm:$0xff] %vm32_vm0, %v160_v40 }
 0x288   :  { %v171_v41 = vld [vmem:[#allocation3] sm:$0xff] }
 0x289   :  { %217 = vlog2.f32 %v171_v41 }
 0x28c   :  { %v172_v42 = vld [vmem:[#allocation3 + $0x8] sm:$0xff] }
 0x28d   :  { %219 = vlog2.f32 %v172_v42 }
 0x296   :  { %v218_v43 = vpop.eup %217 }
 0x297   :  { %v174_v44 = vmul.f32 0.6931472, %v218_v43 }
 0x299   :  { %v177_v47 = vadd.f32 %v174_v44, %v169_v45 }
 0x29a   :  { %v220_v48 = vpop.eup %219 }
 0x29b   :  { %v181_v49 = vsub.f32 %v177_v47, %v179_v46  ;;  %v176_v50 = vmul.f32 0.6931472, %v220_v48 }
 0x29d   :  { %183 = vst.msk [vmem:[%s307_s3] sm:$0xff] %vm32_vm0, %v181_v49  ;;  %v178_v53 = vadd.f32 %v176_v50, %v170_v51 }
 0x29f   :  { %v182_v54 = vsub.f32 %v178_v53, %v180_v52 }
 0x2a1   :  { %184 = vst.msk [vmem:[%s307_s3 + $0x8] sm:$0xff] %vm32_vm0, %v182_v54 }
 0x2a2   :  { %189 = vsyncpa [#allocation5], 1 }

</bundles_post_ra>
